<compile_context>
chip_gen: v7x
topology: tpu7x:2x2x1
jax: 0.10.0
libtpu: 0.0.40
codegen_flags: <defaults>
</compile_context>

<pallas_src>
import math
from functools import partial

import jax
import jax.numpy as jnp
from jax.experimental import pallas as pl
from jax.experimental.pallas import tpu as pltpu

# ----- static config (mirrors CoupledVAE.__init__ with mode=-1) -----
X_DIM1, X_DIM2 = 12, 8
COND_DIM1, COND_DIM2 = 3, 2
H_DIMS1 = [32, 16]
H_DIMS2 = [24, 16]
Z_DIM = 8
BATCH = 8
N_FEAT = X_DIM1 + X_DIM2                       # 20
COND_DIM = COND_DIM1 + COND_DIM2               # 5
N_FEAT_TOT = N_FEAT + COND_DIM                 # 25
IN_LANES = N_FEAT_TOT + Z_DIM                  # 33 = [x1|x2|cond1|cond2|eps]

# vars_meta (static stand-in for the pandas frame): x2 columns 0..3 numerical,
# columns 4..7 form one categorical one-hot block.
NUM_COL_IDX = (0, 1, 2, 3)
CAT_BLOCKS = ((4, 7),)
assert NUM_COL_IDX == tuple(range(len(NUM_COL_IDX)))
assert CAT_BLOCKS == ((len(NUM_COL_IDX), X_DIM2 - 1),)
SIG_LANES = X_DIM1 + len(NUM_COL_IDX)          # 16: lanes 0:16 -> sigmoid
CAT_START, CAT_END = SIG_LANES, N_FEAT         # lanes 16:20 -> softmax

BN_EPS = 1e-5

# fused layer widths
ENC_H0 = H_DIMS1[0] + H_DIMS2[0]               # 56 = [h1_0 | h2_0]
ENC_H1 = H_DIMS1[1] + H_DIMS2[1]               # 32 = hall = [h1 | h2]
DEC_H0 = H_DIMS1[-1] + H_DIMS2[-1]             # 32 = [d1_0 | d2_0]
DEC_H1 = H_DIMS1[0] + H_DIMS2[0]               # 56 = [d1_1 | d2_1]
ZH_LANES = 3 * Z_DIM                           # 24 = [mu | log_var | 0.5*log_var]
OUT_LANES = N_FEAT + 3 * Z_DIM                 # 44 = [recon | z | mu | log_var]

SLAB_LANES = 128                               # lane-padded bf16 parameter slab

# (name, rows, cols) of each fused parameter inside the slab, in pack order.
_PACK_LAYOUT = (
    ("we1", IN_LANES, ENC_H0), ("be1", 1, ENC_H0),
    ("we2", ENC_H0, ENC_H1),   ("be2", 1, ENC_H1),
    ("wz",  ENC_H1, ZH_LANES), ("bz",  1, ZH_LANES),
    ("wdz1", Z_DIM, DEC_H0), ("wdc1", IN_LANES, DEC_H0), ("bd1", 1, DEC_H0),
    ("wd2", DEC_H0, DEC_H1),   ("bd2", 1, DEC_H1),
    ("wd3", DEC_H1, N_FEAT),   ("bd3", 1, N_FEAT),
)


def _round8(n):
    return ((n + 7) // 8) * 8


def _round16(n):       # bf16 vregs are (16, 128): align param rows to 16 sublanes
    return ((n + 15) // 16) * 16


def _make_meta():
    meta, off = {}, 0
    for name, rows, cols in _PACK_LAYOUT:
        meta[name] = (off, rows, cols)          # static row offsets (compile-time)
        off += _round16(rows)
    return meta, off


PARAM_META, SLAB_ROWS = _make_meta()            # SLAB_ROWS == 400


# --------------------------------------------------------------------------
# host-side parameters
# --------------------------------------------------------------------------
def _init_raw_params():
    """Fresh-init, PyTorch-shaped weights (bf16-rounded f32, shared by kernel & ref)."""
    key = jax.random.PRNGKey(42)
    counter = [0]

    def nxt():
        counter[0] += 1
        return jax.random.fold_in(key, counter[0])

    def linear(din, dout):
        rb = lambda a: a.astype(jnp.bfloat16).astype(jnp.float32)
        w = rb(jax.random.normal(nxt(), (din, dout), jnp.float32) * 0.1)   # (in, out)
        b = rb(jax.random.normal(nxt(), (1, dout), jnp.float32) * 0.05)
        return w, b

    h1r, h2r = H_DIMS1[::-1], H_DIMS2[::-1]
    return {
        "enc1": [linear(X_DIM1 + COND_DIM1, H_DIMS1[0]), linear(H_DIMS1[0], H_DIMS1[1])],
        "enc2": [linear(X_DIM2 + COND_DIM2, H_DIMS2[0]), linear(H_DIMS2[0], H_DIMS2[1])],
        "zmu": linear(ENC_H1, Z_DIM),
        "zvar": linear(ENC_H1, Z_DIM),
        "dec1_hidden": [linear(Z_DIM + COND_DIM1, h1r[0]), linear(h1r[0], h1r[1])],
        "dec1_out": linear(h1r[1], X_DIM1),
        "dec2_hidden": [linear(Z_DIM + COND_DIM2, h2r[0]), linear(h2r[0], h2r[1])],
        "dec2_out": linear(h2r[1], X_DIM2),
    }


def _build_packed_params(raw):
    """BN-fold, block-diag fuse and pack everything into one bf16 (SLAB_ROWS,128) slab."""
    bn = 1.0 / math.sqrt(1.0 + BN_EPS)          # eval-mode BN of a fresh model
    fold = lambda wb: (wb[0] * bn, wb[1] * bn)

    (w_e1_0, b_e1_0), (w_e1_1, b_e1_1) = [fold(l) for l in raw["enc1"]]
    (w_e2_0, b_e2_0), (w_e2_1, b_e2_1) = [fold(l) for l in raw["enc2"]]
    w_zmu, b_zmu = raw["zmu"]
    w_zvr, b_zvr = raw["zvar"]
    (w_d1_0, b_d1_0), (w_d1_1, b_d1_1) = [fold(l) for l in raw["dec1_hidden"]]
    (w_d2_0, b_d2_0), (w_d2_1, b_d2_1) = [fold(l) for l in raw["dec2_hidden"]]
    w_d1_o, b_d1_o = raw["dec1_out"]
    w_d2_o, b_d2_o = raw["dec2_out"]

    H1A = H_DIMS1[0]                            # 32
    D1A, D1B = H_DIMS1[::-1][0], H_DIMS1[::-1][1]   # 16, 32

    fused = {}

    # encoder layer 1: [x1|x2|cond1|cond2|eps](33) -> [h1_0(32) | h2_0(24)]
    we1 = jnp.zeros((IN_LANES, ENC_H0), jnp.float32)
    we1 = we1.at[0:X_DIM1, 0:H1A].set(w_e1_0[0:X_DIM1])
    we1 = we1.at[N_FEAT:N_FEAT + COND_DIM1, 0:H1A].set(w_e1_0[X_DIM1:])
    we1 = we1.at[X_DIM1:N_FEAT, H1A:].set(w_e2_0[0:X_DIM2])
    we1 = we1.at[N_FEAT + COND_DIM1:N_FEAT_TOT, H1A:].set(w_e2_0[X_DIM2:])
    fused["we1"] = we1                          # eps rows (25:33) stay zero
    fused["be1"] = jnp.concatenate([b_e1_0, b_e2_0], axis=-1)

    # encoder layer 2 (block-diag): (56) -> hall (32)
    we2 = jnp.zeros((ENC_H0, ENC_H1), jnp.float32)
    we2 = we2.at[0:H1A, 0:H_DIMS1[1]].set(w_e1_1)
    we2 = we2.at[H1A:, H_DIMS1[1]:].set(w_e2_1)
    fused["we2"] = we2
    fused["be2"] = jnp.concatenate([b_e1_1, b_e2_1], axis=-1)

    # fused z heads: hall(32) -> [mu(8) | log_var(8) | 0.5*log_var(8)]
    fused["wz"] = jnp.concatenate([w_zmu, w_zvr, 0.5 * w_zvr], axis=-1)
    fused["bz"] = jnp.concatenate([b_zmu, b_zvr, 0.5 * b_zvr], axis=-1)

    # decoder layer 1 (split dot): z(8) + full-input cond rows -> [d1_0(16)|d2_0(16)]
    fused["wdz1"] = jnp.concatenate([w_d1_0[:Z_DIM], w_d2_0[:Z_DIM]], axis=-1)
    wdc1 = jnp.zeros((IN_LANES, DEC_H0), jnp.float32)   # only cond rows nonzero
    wdc1 = wdc1.at[N_FEAT:N_FEAT + COND_DIM1, 0:D1A].set(w_d1_0[Z_DIM:])
    wdc1 = wdc1.at[N_FEAT + COND_DIM1:N_FEAT_TOT, D1A:].set(w_d2_0[Z_DIM:])
    fused["wdc1"] = wdc1
    fused["bd1"] = jnp.concatenate([b_d1_0, b_d2_0], axis=-1)

    # decoder layer 2 (block-diag): (32) -> [d1_1(32) | d2_1(24)]
    wd2 = jnp.zeros((DEC_H0, DEC_H1), jnp.float32)
    wd2 = wd2.at[0:D1A, 0:D1B].set(w_d1_1)
    wd2 = wd2.at[D1A:, D1B:].set(w_d2_1)
    fused["wd2"] = wd2
    fused["bd2"] = jnp.concatenate([b_d1_1, b_d2_1], axis=-1)

    # decoder output (block-diag): (56) -> [x1_h(12) | x2_h(8)]
    wd3 = jnp.zeros((DEC_H1, N_FEAT), jnp.float32)
    wd3 = wd3.at[0:D1B, 0:X_DIM1].set(w_d1_o)
    wd3 = wd3.at[D1B:, X_DIM1:].set(w_d2_o)
    fused["wd3"] = wd3
    fused["bd3"] = jnp.concatenate([b_d1_o, b_d2_o], axis=-1)

    slab = jnp.zeros((SLAB_ROWS, SLAB_LANES), jnp.float32)
    for name, (r0, rows, cols) in PARAM_META.items():
        slab = slab.at[r0:r0 + rows, 0:cols].set(fused[name])
    return slab.astype(jnp.bfloat16)


# --------------------------------------------------------------------------
# Pallas kernel: one (TILE_B, 33) input block -> one (TILE_B, 44) output block
# --------------------------------------------------------------------------
def _coupled_vae_kernel(in_ref, p_ref, out_ref):
    def ld(name):
        r0, rows, cols = PARAM_META[name]       # static offsets -> static slices
        return p_ref[r0:r0 + rows, 0:cols]

    def dense(x_bf16, wname, bname):            # bf16 MXU, f32 accumulate
        return (jnp.dot(x_bf16, ld(wname), preferred_element_type=jnp.float32)
                + ld(bname).astype(jnp.float32))

    x = in_ref[...]                                                   # (TB, 33) bf16

    # fused encoders (BN folded, dropout = eval identity); ReLU in f32
    h = jnp.maximum(dense(x, "we1", "be1"), 0.0).astype(jnp.bfloat16)      # (TB, 56)
    hall = jnp.maximum(dense(h, "we2", "be2"), 0.0).astype(jnp.bfloat16)   # (TB, 32)

    zh = dense(hall, "wz", "bz")                # (TB, 24) = [mu | log_var | 0.5*log_var]
    mu = zh[:, 0:Z_DIM]
    log_var = zh[:, Z_DIM:2 * Z_DIM]
    logvar_half = zh[:, 2 * Z_DIM:3 * Z_DIM]

    # reparameterization (eps rides in the input stream, lanes 25:33)
    eps = x[:, N_FEAT_TOT:IN_LANES].astype(jnp.float32)
    z = eps * jnp.exp(logvar_half) + mu                                # (TB, 8) f32

    # fused decoders: z dot + zero-padded full-input cond dot (no lane slicing)
    d = (jnp.dot(z.astype(jnp.bfloat16), ld("wdz1"), preferred_element_type=jnp.float32)
         + jnp.dot(x, ld("wdc1"), preferred_element_type=jnp.float32)
         + ld("bd1").astype(jnp.float32))
    d = jnp.maximum(d, 0.0).astype(jnp.bfloat16)                       # (TB, 32)
    d = jnp.maximum(dense(d, "wd2", "bd2"), 0.0).astype(jnp.bfloat16)  # (TB, 56)
    o = dense(d, "wd3", "bd3")                                         # (TB, 20) f32

    # output heads, written directly into lane sub-slices of the fused output
    out_ref[:, 0:SIG_LANES] = jax.nn.sigmoid(o[:, 0:SIG_LANES])        # x1 + numerical x2
    logits = o[:, CAT_START:CAT_END]                                   # categorical block
    e = jnp.exp(logits - jnp.max(logits, axis=-1, keepdims=True))
    out_ref[:, CAT_START:CAT_END] = e * pl.reciprocal(
        jnp.sum(e, axis=-1, keepdims=True))                            # exact reciprocal
    out_ref[:, N_FEAT:N_FEAT + Z_DIM] = z
    out_ref[:, N_FEAT + Z_DIM:N_FEAT + 2 * Z_DIM] = mu
    out_ref[:, N_FEAT + 2 * Z_DIM:N_FEAT + 3 * Z_DIM] = log_var


# --------------------------------------------------------------------------
# wrapper: batch grid, resident parameter slab, both TCs on v7x
# --------------------------------------------------------------------------
@partial(jax.jit, static_argnames=("tile_b",))
def coupled_vae_forward(data, eps, param_slab, tile_b=512):
    """Returns (reconstruction, z, mu, log_var), matching CoupledVAE.forward.

    tile_b=512 keeps the per-step working set tiny on every chip (well under the
    32 MiB scoped VMEM default, incl. v7x's 64 MiB/TC); raise to 2048+ for very
    large batches.
    """
    batch = data.shape[0]
    # single fused input stream: [data(25) | eps(8)], bf16 (halves input DMA bytes)
    packed_in = jnp.concatenate(
        [data.astype(jnp.float32), eps.astype(jnp.float32)], axis=-1
    ).astype(jnp.bfloat16)                                             # (B, 33)

    tb = min(tile_b, _round8(batch))
    grid = (pl.cdiv(batch, tb),)

    fused = pl.pallas_call(
        _coupled_vae_kernel,
        out_shape=jax.ShapeDtypeStruct((batch, OUT_LANES), jnp.float32),
        grid=grid,
        in_specs=[
            pl.BlockSpec((tb, IN_LANES), lambda i: (i, 0)),
            # full-slab block with constant index -> fetched once, stays resident
            pl.BlockSpec((SLAB_ROWS, SLAB_LANES), lambda i: (0, 0)),
        ],
        out_specs=pl.BlockSpec((tb, OUT_LANES), lambda i: (i, 0)),
        compiler_params=pltpu.CompilerParams(
            dimension_semantics=("parallel",)),
    )(packed_in, param_slab)

    out = fused[:, :N_FEAT]
    z = fused[:, N_FEAT:N_FEAT + Z_DIM]
    mu = fused[:, N_FEAT + Z_DIM:N_FEAT + 2 * Z_DIM]
    log_var = fused[:, N_FEAT + 2 * Z_DIM:]
    return out, z, mu, log_var


# --------------------------------------------------------------------------
# pure-JAX UNFUSED reference (mirrors the PyTorch forward, eval mode)
# --------------------------------------------------------------------------
def _reference_forward(data, eps, raw):
    bn = 1.0 / math.sqrt(1.0 + BN_EPS)
    lin = lambda x, wb: x @ wb[0] + wb[1]

    x1 = data[:, :X_DIM1]
    x2 = data[:, X_DIM1:N_FEAT]
    cond1 = data[:, N_FEAT:N_FEAT + COND_DIM1]
    cond2 = data[:, N_FEAT + COND_DIM1:N_FEAT_TOT]

    h1 = jnp.concatenate([x1, cond1], axis=-1)
    for wb in raw["enc1"]:
        h1 = jax.nn.relu(lin(h1, wb) * bn)
    h2 = jnp.concatenate([x2, cond2], axis=-1)
    for wb in raw["enc2"]:
        h2 = jax.nn.relu(lin(h2, wb) * bn)
    hall = jnp.concatenate([h1, h2], axis=-1)

    mu = lin(hall, raw["zmu"])
    log_var = lin(hall, raw["zvar"])
    z = eps * jnp.exp(0.5 * log_var) + mu

    d1 = jnp.concatenate([z, cond1], axis=-1)
    for wb in raw["dec1_hidden"]:
        d1 = jax.nn.relu(lin(d1, wb) * bn)
    x1h = jax.nn.sigmoid(lin(d1, raw["dec1_out"]))

    d2 = jnp.concatenate([z, cond2], axis=-1)
    for wb in raw["dec2_hidden"]:
        d2 = jax.nn.relu(lin(d2, wb) * bn)
    h2o = lin(d2, raw["dec2_out"])
    x2h_num = jax.nn.sigmoid(h2o[:, :len(NUM_COL_IDX)])
    i0, i1 = CAT_BLOCKS[0]
    x2h_cat = jax.nn.softmax(h2o[:, i0:i1 + 1], axis=-1)

    recon = jnp.concatenate([x1h, x2h_num, x2h_cat], axis=-1)
    return recon, z, mu, log_var


if __name__ == "__main__":
    raw = _init_raw_params()
    param_slab = _build_packed_params(raw)

    key = jax.random.PRNGKey(0)
    kd, ke = jax.random.split(key)

    # (batch=8, single block) and (batch=64, 4-step grid) to exercise both paths
    for batch, tile_b in ((BATCH, 512), (64, 16)):
        data = jax.random.uniform(jax.random.fold_in(kd, batch),
                                  (batch, N_FEAT_TOT), dtype=jnp.float32)
        eps = jax.random.normal(jax.random.fold_in(ke, batch),
                                (batch, Z_DIM), dtype=jnp.float32)

        out, z, mu, log_var = coupled_vae_forward(data, eps, param_slab, tile_b=tile_b)
        jax.block_until_ready((out, z, mu, log_var))

        assert out.shape == (batch, N_FEAT)
        assert z.shape == (batch, Z_DIM)
        assert mu.shape == (batch, Z_DIM)
        assert log_var.shape == (batch, Z_DIM)

        # categorical softmax block sums to 1 (exact reciprocal -> tight)
        cat_sums = jnp.sum(out[:, X_DIM1 + CAT_BLOCKS[0][0]:
                               X_DIM1 + CAT_BLOCKS[0][1] + 1], axis=-1)
        assert bool(jnp.all(jnp.abs(cat_sums - 1.0) < 2e-3)), "softmax not normalized"

        # unfused f32 reference with the same (bf16-rounded) raw weights/inputs
        data_b = data.astype(jnp.bfloat16).astype(jnp.float32)
        eps_b = eps.astype(jnp.bfloat16).astype(jnp.float32)
        r_out, r_z, r_mu, r_lv = _reference_forward(data_b, eps_b, raw)

        got = jnp.concatenate([out, z, mu, log_var], axis=-1)
        ref = jnp.concatenate([r_out, r_z, r_mu, r_lv], axis=-1)
        err = float(jnp.max(jnp.abs(got - ref)))
        assert err < 5e-2, f"mismatch vs unfused reference: max abs err {err}"

    print("KERNEL_OK")
</pallas_src>

<mosaic_0001>
module attributes {stable_mosaic.version = 11 : i64} {
  func.func @_coupled_vae_kernel(%arg0: i32, %arg1: memref<8x33xbf16, #tpu.memory_space<vmem>>, %arg2: memref<400x128xbf16, #tpu.memory_space<vmem>>, %arg3: memref<8x44xf32, #tpu.memory_space<vmem>>) attributes {dimension_semantics = [#tpu.dimension_semantics<parallel>], iteration_bounds = array<i64: 1>, scalar_prefetch = 0 : i64, scratch_operands = 0 : i64, tpu.core_type = #tpu.core_type<tc>, window_params = [{transform_indices = @transform_0, window_bounds = array<i64: 8, 33>}, {pipeline_mode = #tpu.pipeline_mode<synchronous>, transform_indices = @transform_1, window_bounds = array<i64: 400, 128>}, {transform_indices = @transform_2, window_bounds = array<i64: 8, 44>}]} {
    %c0 = arith.constant 0 : index
    %c0_0 = arith.constant 0 : index
    %0 = vector.load %arg1[%c0, %c0_0] : memref<8x33xbf16, #tpu.memory_space<vmem>>, vector<8x33xbf16>
    %c0_1 = arith.constant 0 : index
    %c0_2 = arith.constant 0 : index
    %1 = vector.load %arg2[%c0_1, %c0_2] : memref<400x128xbf16, #tpu.memory_space<vmem>>, vector<33x56xbf16>
    %cst = arith.constant dense<0.000000e+00> : vector<8x56xf32>
    %2 = tpu.matmul %0, %1, %cst {dimension_numbers = #tpu.dot_dimension_numbers<[1], [0], [0], [1], [0, 0, 1, 1], [], []>} : vector<8x33xbf16>, vector<33x56xbf16>, vector<8x56xf32> -> vector<8x56xf32>
    %c48 = arith.constant 48 : index
    %c0_3 = arith.constant 0 : index
    %3 = vector.load %arg2[%c48, %c0_3] : memref<400x128xbf16, #tpu.memory_space<vmem>>, vector<1x56xbf16>
    %4 = arith.extf %3 : vector<1x56xbf16> to vector<1x56xf32>
    %5 = vector.broadcast %4 : vector<1x56xf32> to vector<8x56xf32>
    %6 = arith.addf %2, %5 : vector<8x56xf32>
    %cst_4 = arith.constant 0.000000e+00 : f32
    %7 = vector.broadcast %cst_4 : f32 to vector<8x56xf32>
    %8 = arith.maximumf %6, %7 : vector<8x56xf32>
    %9 = arith.truncf %8 : vector<8x56xf32> to vector<8x56xbf16>
    %c64 = arith.constant 64 : index
    %c0_5 = arith.constant 0 : index
    %10 = vector.load %arg2[%c64, %c0_5] : memref<400x128xbf16, #tpu.memory_space<vmem>>, vector<56x32xbf16>
    %cst_6 = arith.constant dense<0.000000e+00> : vector<8x32xf32>
    %11 = tpu.matmul %9, %10, %cst_6 {dimension_numbers = #tpu.dot_dimension_numbers<[1], [0], [0], [1], [0, 0, 1, 1], [], []>} : vector<8x56xbf16>, vector<56x32xbf16>, vector<8x32xf32> -> vector<8x32xf32>
    %c128 = arith.constant 128 : index
    %c0_7 = arith.constant 0 : index
    %12 = vector.load %arg2[%c128, %c0_7] : memref<400x128xbf16, #tpu.memory_space<vmem>>, vector<1x32xbf16>
    %13 = arith.extf %12 : vector<1x32xbf16> to vector<1x32xf32>
    %14 = vector.broadcast %13 : vector<1x32xf32> to vector<8x32xf32>
    %15 = arith.addf %11, %14 : vector<8x32xf32>
    %cst_8 = arith.constant 0.000000e+00 : f32
    %16 = vector.broadcast %cst_8 : f32 to vector<8x32xf32>
    %17 = arith.maximumf %15, %16 : vector<8x32xf32>
    %18 = arith.truncf %17 : vector<8x32xf32> to vector<8x32xbf16>
    %c144 = arith.constant 144 : index
    %c0_9 = arith.constant 0 : index
    %19 = vector.load %arg2[%c144, %c0_9] : memref<400x128xbf16, #tpu.memory_space<vmem>>, vector<32x24xbf16>
    %cst_10 = arith.constant dense<0.000000e+00> : vector<8x24xf32>
    %20 = tpu.matmul %18, %19, %cst_10 {dimension_numbers = #tpu.dot_dimension_numbers<[1], [0], [0], [1], [0, 0, 1, 1], [], []>} : vector<8x32xbf16>, vector<32x24xbf16>, vector<8x24xf32> -> vector<8x24xf32>
    %c176 = arith.constant 176 : index
    %c0_11 = arith.constant 0 : index
    %21 = vector.load %arg2[%c176, %c0_11] : memref<400x128xbf16, #tpu.memory_space<vmem>>, vector<1x24xbf16>
    %22 = arith.extf %21 : vector<1x24xbf16> to vector<1x24xf32>
    %23 = vector.broadcast %22 : vector<1x24xf32> to vector<8x24xf32>
    %24 = arith.addf %20, %23 : vector<8x24xf32>
    %25 = vector.extract_strided_slice %24 {offsets = [0, 0], sizes = [8, 8], strides = [1, 1]} : vector<8x24xf32> to vector<8x8xf32>
    %26 = vector.extract_strided_slice %24 {offsets = [0, 8], sizes = [8, 8], strides = [1, 1]} : vector<8x24xf32> to vector<8x8xf32>
    %27 = vector.extract_strided_slice %24 {offsets = [0, 16], sizes = [8, 8], strides = [1, 1]} : vector<8x24xf32> to vector<8x8xf32>
    %28 = vector.extract_strided_slice %0 {offsets = [0, 25], sizes = [8, 8], strides = [1, 1]} : vector<8x33xbf16> to vector<8x8xbf16>
    %29 = arith.extf %28 : vector<8x8xbf16> to vector<8x8xf32>
    %30 = math.exp %27 : vector<8x8xf32>
    %31 = arith.mulf %29, %30 : vector<8x8xf32>
    %32 = arith.addf %31, %25 : vector<8x8xf32>
    %33 = arith.truncf %32 : vector<8x8xf32> to vector<8x8xbf16>
    %c192 = arith.constant 192 : index
    %c0_12 = arith.constant 0 : index
    %34 = vector.load %arg2[%c192, %c0_12] : memref<400x128xbf16, #tpu.memory_space<vmem>>, vector<8x32xbf16>
    %cst_13 = arith.constant dense<0.000000e+00> : vector<8x32xf32>
    %35 = tpu.matmul %33, %34, %cst_13 {dimension_numbers = #tpu.dot_dimension_numbers<[1], [0], [0], [1], [0, 0, 1, 1], [], []>} : vector<8x8xbf16>, vector<8x32xbf16>, vector<8x32xf32> -> vector<8x32xf32>
    %c208 = arith.constant 208 : index
    %c0_14 = arith.constant 0 : index
    %36 = vector.load %arg2[%c208, %c0_14] : memref<400x128xbf16, #tpu.memory_space<vmem>>, vector<33x32xbf16>
    %cst_15 = arith.constant dense<0.000000e+00> : vector<8x32xf32>
    %37 = tpu.matmul %0, %36, %cst_15 {dimension_numbers = #tpu.dot_dimension_numbers<[1], [0], [0], [1], [0, 0, 1, 1], [], []>} : vector<8x33xbf16>, vector<33x32xbf16>, vector<8x32xf32> -> vector<8x32xf32>
    %38 = arith.addf %35, %37 : vector<8x32xf32>
    %c256 = arith.constant 256 : index
    %c0_16 = arith.constant 0 : index
    %39 = vector.load %arg2[%c256, %c0_16] : memref<400x128xbf16, #tpu.memory_space<vmem>>, vector<1x32xbf16>
    %40 = arith.extf %39 : vector<1x32xbf16> to vector<1x32xf32>
    %41 = vector.broadcast %40 : vector<1x32xf32> to vector<8x32xf32>
    %42 = arith.addf %38, %41 : vector<8x32xf32>
    %cst_17 = arith.constant 0.000000e+00 : f32
    %43 = vector.broadcast %cst_17 : f32 to vector<8x32xf32>
    %44 = arith.maximumf %42, %43 : vector<8x32xf32>
    %45 = arith.truncf %44 : vector<8x32xf32> to vector<8x32xbf16>
    %c272 = arith.constant 272 : index
    %c0_18 = arith.constant 0 : index
    %46 = vector.load %arg2[%c272, %c0_18] : memref<400x128xbf16, #tpu.memory_space<vmem>>, vector<32x56xbf16>
    %cst_19 = arith.constant dense<0.000000e+00> : vector<8x56xf32>
    %47 = tpu.matmul %45, %46, %cst_19 {dimension_numbers = #tpu.dot_dimension_numbers<[1], [0], [0], [1], [0, 0, 1, 1], [], []>} : vector<8x32xbf16>, vector<32x56xbf16>, vector<8x56xf32> -> vector<8x56xf32>
    %c304 = arith.constant 304 : index
    %c0_20 = arith.constant 0 : index
    %48 = vector.load %arg2[%c304, %c0_20] : memref<400x128xbf16, #tpu.memory_space<vmem>>, vector<1x56xbf16>
    %49 = arith.extf %48 : vector<1x56xbf16> to vector<1x56xf32>
    %50 = vector.broadcast %49 : vector<1x56xf32> to vector<8x56xf32>
    %51 = arith.addf %47, %50 : vector<8x56xf32>
    %cst_21 = arith.constant 0.000000e+00 : f32
    %52 = vector.broadcast %cst_21 : f32 to vector<8x56xf32>
    %53 = arith.maximumf %51, %52 : vector<8x56xf32>
    %54 = arith.truncf %53 : vector<8x56xf32> to vector<8x56xbf16>
    %c320 = arith.constant 320 : index
    %c0_22 = arith.constant 0 : index
    %55 = vector.load %arg2[%c320, %c0_22] : memref<400x128xbf16, #tpu.memory_space<vmem>>, vector<56x20xbf16>
    %cst_23 = arith.constant dense<0.000000e+00> : vector<8x20xf32>
    %56 = tpu.matmul %54, %55, %cst_23 {dimension_numbers = #tpu.dot_dimension_numbers<[1], [0], [0], [1], [0, 0, 1, 1], [], []>} : vector<8x56xbf16>, vector<56x20xbf16>, vector<8x20xf32> -> vector<8x20xf32>
    %c384 = arith.constant 384 : index
    %c0_24 = arith.constant 0 : index
    %57 = vector.load %arg2[%c384, %c0_24] : memref<400x128xbf16, #tpu.memory_space<vmem>>, vector<1x20xbf16>
    %58 = arith.extf %57 : vector<1x20xbf16> to vector<1x20xf32>
    %59 = vector.broadcast %58 : vector<1x20xf32> to vector<8x20xf32>
    %60 = arith.addf %56, %59 : vector<8x20xf32>
    %61 = vector.extract_strided_slice %60 {offsets = [0, 0], sizes = [8, 16], strides = [1, 1]} : vector<8x20xf32> to vector<8x16xf32>
    %62 = arith.negf %61 : vector<8x16xf32>
    %63 = math.exp %62 : vector<8x16xf32>
    %cst_25 = arith.constant 1.000000e+00 : f32
    %64 = vector.broadcast %cst_25 : f32 to vector<8x16xf32>
    %65 = arith.addf %64, %63 : vector<8x16xf32>
    %66 = arith.divf %64, %65 : vector<8x16xf32>
    %c0_26 = arith.constant 0 : index
    %c0_27 = arith.constant 0 : index
    %67 = vector.load %arg3[%c0_26, %c0_27] : memref<8x44xf32, #tpu.memory_space<vmem>>, vector<8x16xf32>
    tpu.vector_store %arg3[%c0_26, %c0_27], %66 {strides = array<i32>} : memref<8x44xf32, #tpu.memory_space<vmem>>, vector<8x16xf32>,
    %68 = vector.extract_strided_slice %60 {offsets = [0, 16], sizes = [8, 4], strides = [1, 1]} : vector<8x20xf32> to vector<8x4xf32>
    %cst_28 = arith.constant dense<0xFF800000> : vector<8xf32>
    %69 = vector.multi_reduction <maximumf>, %68, %cst_28 [1] : vector<8x4xf32> to vector<8xf32>
    %70 = vector.shape_cast %69 : vector<8xf32> to vector<8x1xf32>
    %71 = vector.broadcast %70 : vector<8x1xf32> to vector<8x4xf32>
    %72 = arith.subf %68, %71 : vector<8x4xf32>
    %73 = math.exp %72 : vector<8x4xf32>
    %cst_29 = arith.constant dense<0.000000e+00> : vector<8xf32>
    %74 = vector.multi_reduction <add>, %73, %cst_29 [1] : vector<8x4xf32> to vector<8xf32>
    %75 = vector.shape_cast %74 : vector<8xf32> to vector<8x1xf32>
    %76 = tpu.reciprocal %75 : vector<8x1xf32> -> vector<8x1xf32>
    %77 = vector.broadcast %76 : vector<8x1xf32> to vector<8x4xf32>
    %78 = arith.mulf %73, %77 : vector<8x4xf32>
    %c0_30 = arith.constant 0 : index
    %c16 = arith.constant 16 : index
    %79 = vector.load %arg3[%c0_30, %c16] : memref<8x44xf32, #tpu.memory_space<vmem>>, vector<8x4xf32>
    tpu.vector_store %arg3[%c0_30, %c16], %78 {strides = array<i32>} : memref<8x44xf32, #tpu.memory_space<vmem>>, vector<8x4xf32>,
    %c0_31 = arith.constant 0 : index
    %c20 = arith.constant 20 : index
    %80 = vector.load %arg3[%c0_31, %c20] : memref<8x44xf32, #tpu.memory_space<vmem>>, vector<8x8xf32>
    tpu.vector_store %arg3[%c0_31, %c20], %32 {strides = array<i32>} : memref<8x44xf32, #tpu.memory_space<vmem>>, vector<8x8xf32>,
    %c0_32 = arith.constant 0 : index
    %c28 = arith.constant 28 : index
    %81 = vector.load %arg3[%c0_32, %c28] : memref<8x44xf32, #tpu.memory_space<vmem>>, vector<8x8xf32>
    tpu.vector_store %arg3[%c0_32, %c28], %25 {strides = array<i32>} : memref<8x44xf32, #tpu.memory_space<vmem>>, vector<8x8xf32>,
    %c0_33 = arith.constant 0 : index
    %c36 = arith.constant 36 : index
    %82 = vector.load %arg3[%c0_33, %c36] : memref<8x44xf32, #tpu.memory_space<vmem>>, vector<8x8xf32>
    tpu.vector_store %arg3[%c0_33, %c36], %26 {strides = array<i32>} : memref<8x44xf32, #tpu.memory_space<vmem>>, vector<8x8xf32>,
    return
  }
  func.func @transform_0(%arg0: i32) -> (i32, i32) {
    %c0_i32 = arith.constant 0 : i32
    %c0_i32_0 = arith.constant 0 : i32
    return %arg0, %c0_i32 : i32, i32
  }
  func.func @transform_1(%arg0: i32) -> (i32, i32) {
    %c0_i32 = arith.constant 0 : i32
    %c0_i32_0 = arith.constant 0 : i32
    %c0_i32_1 = arith.constant 0 : i32
    return %c0_i32, %c0_i32_0 : i32, i32
  }
  func.func @transform_2(%arg0: i32) -> (i32, i32) {
    %c0_i32 = arith.constant 0 : i32
    %c0_i32_0 = arith.constant 0 : i32
    return %arg0, %c0_i32 : i32, i32
  }
}

</mosaic_0001>

<bundles_post_ra>
// kernel: coupled_vae_forward.1
= control target key start
LH: loop header
LB: loop body
LE: loop exit
PB: predicated region body
PF: predicated region fallthrough
CT: control target
= control target key end

     0   :  { %7 = vsyncpa [#allocation3], 0  ;;  %s765_s9 = smov [#allocation2]   ;;  %s893_s0 = inlined_call_operand.vmem [shape: bf16[8,33], index: 0, kind: input, shape index: {}]   ;;  %s894_s1 = inlined_call_operand.hbm [shape: bf16[400,128], index: 1, kind: input, shape index: {}]   ;;  %s895_s2 = inlined_call_operand.vmem [shape: f32[8,44], index: 2, kind: output, shape index: {}]  }
   0x1   :  { %s15_s10 = sshll.u32 %s765_s9, 4  ;;  %s741_s13 = scalar_lea.hbm %s894_s1, 3200  ;;  %s16_s10 = int_to_ptr.vmem [resolvable:$true] %s15_s10 }
   0x2   :  { %p742_p0 = scmp.ne.s32.totalorder %s894_s1, %s741_s13  ;;  %p745_p1 = scmp.lt.u32.totalorder %s741_s13, %s894_s1 }
   0x4   :  { %p747_p2 = pnand %p745_p1, %p742_p0 }
   0x6   :  { %750 = shalt.err (!%p747_p2)
}
   0x7   :  { %s751_s18 = scalar_lea.vmem %s16_s10, 3200  ;;  %p756_p4 = scmp.lt.s32.totalorder %s16_s10, %s16_s10 }
   0x8   :  { %p752_p3 = scmp.ne.s32.totalorder %s16_s10, %s751_s18  ;;  %p757_p5 = scmp.lt.s32.totalorder %s751_s18, %s751_s18 }
   0xa   :  { %p758_p6 = por %p757_p5, %p756_p4 }
   0xc   :  { %p759_p7 = pnand %p758_p6, %p752_p3 }
   0xe   :  { %762 = shalt.err (!%p759_p7)
}
   0xf   :  { %s766_s19 = smov 64   ;;  %s767_s20 = smov 4  }
  0x10   :  { %21 = dma.hbm_to_vmem [thread:$0]  %s894_s1, 3200, %s16_s10, [#allocation3], %s766_s19, %s766_s19, %s767_s20  }
  0x11   :  { %763 = dma.done.wait [#allocation3], 3200  }
  0x12   :  { %764 = vsyncadd [#allocation3], 4294964096  ;;  %v768_v0 = vmov 0.0   ;;  %vm769_vm0 = vmmov 0   ;;  %vm57_vm1 = vcmask 1040384   ;;  %v713_v1 = vld [vmem:[#allocation2] sm:$0xff]   ;;  %v34_v14 = vlaneseq }
  0x13   :  { %635 = vmatprep.subr.bf16.mxu0 %v768_v0  ;;  %641 = vmatprep.mubr.msk.bf16.mxu0 %vm769_vm0, %v768_v0  ;;  %v714_v2 = vld [vmem:[#allocation2 + $0x8] sm:$0xff]   ;;  %v715_v3 = vld [vmem:[#allocation2 + $0x10] ss:$0 sps:$4 sm:$0x11]   ;;  %v717_v4 = vld [vmem:[#allocation2 + $0x20] sm:$0xff]   ;;  %v770_v5 = vmov 0  }
  0x14   :  { %645 = vmatprep.subr.bf16.mxu1 %v768_v0  ;;  %653 = vmatprep.mubr.msk.bf16.mxu1 %vm769_vm0, %v768_v0  ;;  %v811_v6 = vsel %vm57_vm1, 65535, %v770_v5  ;;  %v718_v7 = vld [vmem:[#allocation2 + $0x28] sm:$0xff]   ;;  %vm53_vm2 = vcmask 269312   ;;  %v819_v9 = vld [vmem:[%s893_s0] sm:$0xf]  ;;  %v719_v10 = vld [vmem:[#allocation2 + $0x30] sm:$0xff]  }
  0x15   :  { %636 = vmatpush3.bf16.msra.mxu0 %v713_v1  ;;  %646 = vmatpush3.bf16.msra.mxu1 %v717_v4  ;;  %v61_v8 = vand.u32 %v715_v3, %v811_v6  ;;  %v720_v11 = vld [vmem:[#allocation2 + $0x38] ss:$0 sps:$4 sm:$0xff]   ;;  %vm143_vm3 = vcmask 1043456   ;;  %v721_v13 = vld [vmem:[#allocation2 + $0x48] sm:$0xff]   ;;  %v35_v15 = vshrl.u32 %v34_v14, 7  ;;  %vm139_vm4 = vcmask 457728  }
  0x16   :  { %637 = vmatprep.subr.bf16.mxu0 %v768_v0  ;;  %647 = vmatprep.subr.bf16.mxu1 %v768_v0  ;;  %v145_v12 = vsel %vm143_vm3, %v720_v11, 0  ;;  %v32_v16 = vld [vmem:[#allocation2 + $0x18] sm:$0x1]  ;;  %v722_v27 = vld [vmem:[#allocation2 + $0x50] sm:$0xff]   ;;  %v112_v28 = vld [vmem:[#allocation2 + $0x40] sm:$0x1]  ;;  %v255_v54 = vunpack.c.l.bf16 %v819_v9 }
  0x17   :  { %v33_v17 = vunpack.c.l.bf16 %v32_v16  ;;  %v831_v18 = vsub.s32 0, %v35_v15  ;;  %v113_v29 = vunpack.c.l.bf16 %v112_v28  ;;  %vm211_vm5 = vcmask 261120   ;;  %v193_v38 = vld [vmem:[#allocation2 + $0x58] sm:$0x1]  ;;  %v723_v47 = vld [vmem:[#allocation2 + $0x68] sm:$0xff]   ;;  %v724_v51 = vld [vmem:[#allocation2 + $0x70] sm:$0xff]  }
  0x18   :  { %v194_v39 = vunpack.c.l.bf16 %v193_v38  ;;  %v269_v48 = vld [vmem:[#allocation2 + $0x60] sm:$0xf]  ;;  %v716_v50 = vld [vmem:[#allocation2 + $0x78] ss:$0 sps:$4 sm:$0x11]   ;;  %s771_s0 = smov 9  }
  0x19   :  { %638 = vmatpush3.bf16.msra.mxu0 %v714_v2  ;;  %648 = vmatpush3.bf16.msra.mxu1 %v718_v7  ;;  %v37_v19 = vrot.slane %v33_v17, %v831_v18  ;;  %v117_v30 = vrot.slane %v113_v29, %v831_v18  ;;  %v341_v49 = vsel %vm143_vm3, %v269_v48, 0  ;;  %v291_v53 = vand.u32 %v716_v50, %v811_v6  ;;  %s772_s24 = smov 25   ;;  %s773_s25 = smov 103   ;;  %v725_v2 = vld [vmem:[#allocation2 + $0x88] sm:$0xff]   ;;  %v726_v3 = vld [vmem:[#allocation2 + $0x90] sm:$0xff]   ;;  %v727_v4 = vld [vmem:[#allocation2 + $0xa0] sm:$0xff]  }
  0x1a   :  { %639 = vmatprep.subr.bf16.mxu0 %v768_v0  ;;  %649 = vmatprep.subr.bf16.mxu1 %v768_v0  ;;  %v198_v40 = vrot.slane %v194_v39, %v831_v18  ;;  %vm336_vm6 = vcmask 64512   ;;  %v728_v5 = vld [vmem:[#allocation2 + $0xa8] sm:$0xff]   ;;  %v383_v6 = vld [vmem:[#allocation2 + $0x80] sm:$0x1]  ;;  %v729_v17 = vld [vmem:[#allocation2 + $0xb0] sm:$0xff]   ;;  %vm547_vm7 = vcmask 162944  }
  0x1b   :  { %v384_v7 = vunpack.c.l.bf16 %v383_v6  ;;  %s774_s26 = smov 123   ;;  %vm545_vm8 = vcmask 130048   ;;  %s775_s29 = smov 112   ;;  %vm558_vm9 = vcmask 31744   ;;  %vm569_vm10 = vcmask 228512  }
  0x1c   :  { %s776_s30 = smov 28   ;;  %vm574_vm11 = vcmask 294112   ;;  %vm576_vm12 = vcmask 359712  }
  0x1d   :  { %640 = vmatpush3.bf16.msra.mxu0 %v61_v8  ;;  %650 = vmatpush3.bf16.msra.mxu1 %v719_v10  ;;  %v388_v8 = vrot.slane %v384_v7, %v831_v18 }
  0x1e   :  { %657 = vmatprep.subr.bf16.mxu0 %v768_v0  ;;  %651 = vmatprep.subr.bf16.mxu1 %v768_v0 }
  0x20   :  { %642 = vmatmul.mubr.msk.bf16.vlgmr.msra.gmra.mrb[0].mxu0 %vm53_vm2, %v819_v9 }
  0x21   :  { %661 = vmatprep.mubr.msk.bf16.mxu0 %vm769_vm0, %v768_v0  ;;  %652 = vmatpush3.bf16.msra.mxu1 %v145_v12 }
  0x22   :  { %665 = vmatprep.subr.bf16.mxu1 %v768_v0  ;;  %658 = vmatpush3.bf16.msra.mxu0 %v721_v13 }
  0x23   :  { %659 = vmatprep.subr.bf16.mxu0 %v768_v0 }
  0x26   :  { %660 = vmatpush3.bf16.msra.mxu0 %v722_v27 }
  0x27   :  { %675 = vmatprep.subr.bf16.mxu0 %v768_v0 }
  0xf3   :  { %v97_v20 = vpop.f32.mrb[0].mxu0 }
  0xf4   :  { %v98_v21 = vadd.f32 %v97_v20, %v37_v19  ;;  %v643_v22 = vpop.f32.mrb[1].mxu0  ;;  %v730_v19 = vld [vmem:[#allocation2 + $0xb8] ss:$0 sps:$4 sm:$0xff]  }
  0xf5   :  { %v100_v23 = vpop.f32.mrb[2].mxu0  ;;  %v497_v20 = vsel %vm143_vm3, %v730_v19, 0 }
  0xf6   :  { %v103_v24 = vmax.f32 %v98_v21, 0.0  ;;  %v644_v25 = vpop.f32.mrb[3].mxu0  ;;  %v396_v21 = vld [vmem:[#allocation2 + $0x98] sm:$0x1] }
  0xf7   :  { %v397_v22 = vunpack.c.l.bf16 %v396_v21 }
  0xf8   :  { %v104_v26 = vpack.c.bf16 %v103_v24, %v103_v24 }
  0xf9   :  { %v401_v23 = vrot.slane %v397_v22, %v831_v18 }
  0xfa   :  { %654 = vmatmul.mubr.msk.bf16.vlgmr.msra.gmra.mrb[0].mxu1 %vm139_vm4, %v104_v26 }
  0xfb   :  { %671 = vmatprep.mubr.msk.bf16.mxu1 %vm769_vm0, %v768_v0  ;;  %666 = vmatpush3.bf16.msra.mxu1 %v723_v47 }
  0xfc   :  { %667 = vmatprep.subr.bf16.mxu1 %v768_v0 }
  0xff   :  { %668 = vmatpush3.bf16.msra.mxu1 %v724_v51 }
 0x100   :  { %669 = vmatprep.subr.bf16.mxu1 %v768_v0 }
 0x103   :  { %670 = vmatpush3.bf16.msra.mxu1 %v291_v53 }
 0x104   :  { %689 = vmatprep.subr.bf16.mxu1 %v768_v0 }
 0x106   :  { %672 = vmatmul.mubr.msk.bf16.vlgmr.msra.gmra.mrb[4].mxu1 %vm53_vm2, %v819_v9 }
 0x107   :  { %697 = vmatprep.mubr.msk.bf16.mxu1 %vm769_vm0, %v768_v0  ;;  %690 = vmatpush3.bf16.msra.mxu1 %v727_v4 }
 0x108   :  { %691 = vmatprep.subr.bf16.mxu1 %v768_v0 }
 0x10b   :  { %692 = vmatpush3.bf16.msra.mxu1 %v728_v5 }
 0x10c   :  { %693 = vmatprep.subr.bf16.mxu1 %v768_v0 }
 0x10f   :  { %694 = vmatpush3.bf16.msra.mxu1 %v729_v17 }
 0x110   :  { %695 = vmatprep.subr.bf16.mxu1 %v768_v0 }
 0x113   :  { %696 = vmatpush3.bf16.msra.mxu1 %v497_v20 }
 0x1cd   :  { %v181_v31 = vpop.f32.mrb[0].mxu1 }
 0x1ce   :  { %v182_v32 = vadd.f32 %v181_v31, %v117_v30  ;;  %v655_v33 = vpop.f32.mrb[1].mxu1  ;;  %v466_v31 = vld [vmem:[#allocation2 + $0xc0] sm:$0x1] }
 0x1cf   :  { %v184_v34 = vpop.f32.mrb[2].mxu1 }
 0x1d0   :  { %v187_v35 = vmax.f32 %v182_v32, 0.0  ;;  %v656_v36 = vpop.f32.mrb[3].mxu1  ;;  %v467_v32 = vunpack.c.l.bf16 %v466_v31 }
 0x1d2   :  { %v188_v37 = vpack.c.bf16 %v187_v35, %v187_v35 }
 0x1d4   :  { %662 = vmatmul.mubr.msk.bf16.vlgmr.msra.gmra.mrb[4].mxu0 %vm211_vm5, %v188_v37 }
 0x1d5   :  { %677 = vmatprep.mubr.msk.bf16.mxu0 %vm769_vm0, %v768_v0  ;;  %676 = vmatpush3.bf16.msra.mxu0 %v341_v49 }
 0x1d6   :  { %681 = vmatprep.subr.bf16.mxu0 %v768_v0 }
 0x1d9   :  { %v327_v60 = vpop.f32.mrb[4].mxu1 }
 0x1da   :  { %v673_v61 = vpop.f32.mrb[5].mxu1 }
 0x1db   :  { %v330_v62 = vpop.f32.mrb[6].mxu1 }
 0x1dc   :  { %v674_v63 = vpop.f32.mrb[7].mxu1 }
 0x2a7   :  { %v249_v41 = vpop.f32.mrb[4].mxu0 }
 0x2a8   :  { %v843_v42 = vadd.f32 %v249_v41, %v198_v40  ;;  %v663_v43 = vpop.f32.mrb[5].mxu0 }
 0x2a9   :  { %v252_v44 = vpop.f32.mrb[6].mxu0 }
 0x2aa   :  { %v256_v45 = vmul.f32 1.442695, %v843_v42  ;;  %v664_v46 = vpop.f32.mrb[7].mxu0 }
 0x2ac   :  { %731 = vpow2.f32 %v256_v45 }
 0x2b6   :  { %v732_v52 = vpop.eup %731 }
 0x2b7   :  { %259 = vrot.lane.b32.xlu0 %v732_v52, %s771_s0 }
 0x2bb   :  { %264 = vrot.lane.b32.xlu0 %v843_v42, %s772_s24 }
 0x329   :  { %v260_v55 = vpop.permute.xlu0 %259 }
 0x32a   :  { %v262_v56 = vmul.f32 %v260_v55, %v255_v54 }
 0x32d   :  { %v265_v57 = vpop.permute.xlu0 %264 }
 0x32e   :  { %v858_v58 = vadd.f32 %v265_v57, %v262_v56 }
 0x330   :  { %v268_v59 = vpack.c.bf16 %v858_v58, %v858_v58 }
 0x332   :  { %334 = vrot.lane.b32.xlu1 %v268_v59, %s773_s25 }
 0x3a4   :  { %v335_v1 = vpop.permute.xlu1 %334 }
 0x3a5   :  { %678 = vmatmul.mubr.msk.bf16.vlgmr.msra.gmra.mrb[8].mxu0 %vm336_vm6, %v335_v1 }
 0x3a6   :  { %685 = vmatprep.mubr.msk.bf16.mxu0 %vm769_vm0, %v768_v0  ;;  %682 = vmatpush3.bf16.msra.mxu0 %v725_v2 }
 0x3a7   :  { %683 = vmatprep.subr.bf16.mxu0 %v768_v0  ;;  %v471_v0 = vrot.slane %v467_v32, %v831_v18 }
 0x3aa   :  { %684 = vmatpush3.bf16.msra.mxu0 %v726_v3 }
 0x478   :  { %v377_v9 = vpop.f32.mrb[8].mxu0 }
 0x479   :  { %v378_v10 = vadd.f32 %v377_v9, %v327_v60  ;;  %v679_v11 = vpop.f32.mrb[9].mxu0 }
 0x47a   :  { %v380_v12 = vpop.f32.mrb[10].mxu0 }
 0x47b   :  { %v389_v13 = vadd.f32 %v388_v8, %v378_v10  ;;  %v680_v14 = vpop.f32.mrb[11].mxu0 }
 0x47d   :  { %v390_v15 = vmax.f32 %v389_v13, 0.0 }
 0x47f   :  { %v391_v16 = vpack.c.bf16 %v390_v15, %v390_v15 }
 0x481   :  { %686 = vmatmul.mubr.msk.bf16.vlgmr.msra.gmra.mrb[12].mxu0 %vm211_vm5, %v391_v16 }
 0x554   :  { %v451_v24 = vpop.f32.mrb[12].mxu0 }
 0x555   :  { %v452_v25 = vadd.f32 %v451_v24, %v401_v23  ;;  %v687_v26 = vpop.f32.mrb[13].mxu0 }
 0x556   :  { %v454_v27 = vpop.f32.mrb[14].mxu0 }
 0x557   :  { %v457_v28 = vmax.f32 %v452_v25, 0.0  ;;  %v688_v29 = vpop.f32.mrb[15].mxu0 }
 0x559   :  { %v458_v30 = vpack.c.bf16 %v457_v28, %v457_v28 }
 0x55b   :  { %698 = vmatmul.mubr.msk.bf16.vlgmr.msra.gmra.mrb[8].mxu1 %vm139_vm4, %v458_v30 }
 0x62e   :  { %v533_v33 = vpop.f32.mrb[8].mxu1 }
 0x62f   :  { %v534_v34 = vadd.f32 %v533_v33, %v471_v0  ;;  %v699_v35 = vpop.f32.mrb[9].mxu1 }
 0x630   :  { %v536_v36 = vpop.f32.mrb[10].mxu1 }
 0x631   :  { %v608_v37 = vmul.f32 -1.442695, %v534_v34  ;;  %v700_v38 = vpop.f32.mrb[11].mxu1  ;;  %v548_v39 = vsel %vm547_vm7, %v534_v34, -inf }
 0x632   :  { %549 = vmax.xlane.f32.xlu1 %v548_v39 }
 0x633   :  { %733 = vpow2.f32 %v608_v37 }
 0x63d   :  { %v734_v40 = vpop.eup %733 }
 0x63e   :  { %v542_v41 = vadd.f32 1.0, %v734_v40 }
 0x640   :  { %735 = vrcp.f32 %v542_v41 }
 0x643   :  { %566 = vrot.lane.b32.xlu1 %v858_v58, %s774_s26 }
 0x64a   :  { %v736_v43 = vpop.eup %735 }
 0x64b   :  { %546 = vst.msk [vmem:[%s895_s2] sm:$0xff] %vm545_vm8, %v736_v43 }
 0x6bf   :  { %v550_v18 = vpop.xlane.xlu1 %549 }
 0x6c0   :  { %v551_v44 = vsub.f32 %v534_v34, %v550_v18 }
 0x6c2   :  { %v552_v45 = vmul.f32 1.442695, %v551_v44 }
 0x6c3   :  { %v567_v52 = vpop.permute.xlu1 %566 }
 0x6c4   :  { %737 = vpow2.f32 %v552_v45 }
 0x6ce   :  { %v738_v46 = vpop.eup %737 }
 0x6cf   :  { %555 = vrot.lane.b32.xlu0 %v738_v46, %s775_s29 }
 0x741   :  { %v556_v47 = vpop.permute.xlu0 %555 }
 0x742   :  { %v559_v48 = vsel %vm558_vm9, %v556_v47, 0.0 }
 0x743   :  { %560 = vadd.xlane.f32.xlu0 %v559_v48 }
 0x759   :  { %571 = vrot.lane.b32.xlu0 %v843_v42, %s776_s30 }
 0x7d0   :  { %v561_v49 = vpop.xlane.xlu0 %560 }
 0x7d1   :  { %739 = vrcp.f32 %v561_v49 }
 0x7d4   :  { %v572_v53 = vpop.permute.xlu0 %571 }
 0x7db   :  { %v740_v50 = vpop.eup %739 }
 0x7dc   :  { %v563_v51 = vmul.f32 %v740_v50, %v738_v46 }
 0x7de   :  { %564 = vst.msk [vmem:[%s895_s2] sm:$0xff] %vm547_vm7, %v563_v51 }
 0x7df   :  { %570 = vst.msk [vmem:[%s895_s2] sm:$0xff] %vm569_vm10, %v567_v52 }
 0x7e0   :  { %575 = vst.msk [vmem:[%s895_s2] sm:$0xff] %vm574_vm11, %v572_v53 }
 0x7e1   :  { %577 = vst.msk [vmem:[%s895_s2] sm:$0xff] %vm576_vm12, %v572_v53 }
 0x7e2   :  { %582 = vsyncpa [#allocation3], 1 }

</bundles_post_ra>
